<compile_context>
chip_gen: v7x
topology: tpu7x:2x2x1
jax: 0.10.0
libtpu: 0.0.40
codegen_flags: <defaults>
</compile_context>

<pallas_src>
import functools
import math

import jax
import jax.numpy as jnp
from jax.experimental import pallas as pl
from jax.experimental.pallas import tpu as pltpu


def _round_up(n: int, m: int) -> int:
    return ((n + m - 1) // m) * m


def _sublane(dtype) -> int:
    # Rows per sublane tile for the dtype: 8 (f32), 16 (bf16/f16), 32 (int8/fp8).
    return 8 * (4 // jnp.dtype(dtype).itemsize)


def _choose_tile_m(M: int, tile_m: int, sublane: int) -> int:
    # Keep >= 4 grid steps when M allows (so v7x's 2 TCs each pipeline >= 2 tiles),
    # cap at tile_m for VMEM, always a sublane multiple.
    cap = _round_up(pl.cdiv(M, 4), sublane)
    return max(sublane, min(_round_up(tile_m, sublane), cap))


# ------------------------------- kernels -----------------------------------


def _rank1_kernel(x_ref, wl_ref, wr_ref, b_ref, o_ref):
    # x_ref : (TM, D)  streamed tile of the flattened input
    # wl_ref: (1, D)   W_left^T  (resident: constant index_map)
    # wr_ref: (1, O)   W_right   (resident)
    # b_ref : (1, O)   bias      (resident)
    # o_ref : (TM, O)
    x = x_ref[...].astype(jnp.float32)
    wl = wl_ref[...].astype(jnp.float32)
    # t[m] = sum_d x[m, d] * W_left[d, 0]   == (x @ W_left) for rank 1
    t = jnp.sum(x * wl, axis=-1, keepdims=True)                      # (TM, 1)
    out = t * wr_ref[...].astype(jnp.float32)                        # (TM, O) outer-product apply
    out = out + b_ref[...].astype(jnp.float32)
    o_ref[...] = out.astype(o_ref.dtype)


def _dense_w_kernel(x_ref, w_ref, b_ref, o_ref):
    # x_ref: (TM, D), w_ref: (D, TO), b_ref: (1, TO), o_ref: (TM, TO)
    out = jnp.dot(x_ref[...], w_ref[...], preferred_element_type=jnp.float32)
    out = out + b_ref[...].astype(jnp.float32)
    o_ref[...] = out.astype(o_ref.dtype)


# ------------------------------- wrapper -----------------------------------


@functools.partial(jax.jit, static_argnames=("tile_m",))
def low_rank_linear(x, w_left, w_right, b=None, *, tile_m=1024):
    """Pallas forward of LowRankLinear: x @ (w_left * w_right) + b.

    x: (..., input_dim); w_left: (input_dim, rank); w_right: (rank, output_dim);
    b: (output_dim,) or None (bias=False path).
    """
    *lead, D = x.shape
    R = w_left.shape[-1]
    O = w_right.shape[-1]
    out_dtype = x.dtype

    M = math.prod(lead) if lead else 1
    x2 = x.reshape(M, D)

    if b is None:
        b2 = jnp.zeros((1, O), dtype=jnp.float32)
    else:
        b2 = b.reshape(1, O)

    sub = _sublane(x.dtype)
    tm = _choose_tile_m(M, tile_m, sub)
    num_m = pl.cdiv(M, tm)
    xi = jnp.dtype(x.dtype).itemsize
    oi = jnp.dtype(out_dtype).itemsize
    bi = jnp.dtype(b2.dtype).itemsize

    if R == 1:
        # Factored low-rank path: never builds the (D, O) matrix.
        wl_row = w_left.reshape(1, D)      # column vector -> row layout (lane-dense)
        wr_row = w_right.reshape(1, O)
        wbytes = (D * jnp.dtype(w_left.dtype).itemsize
                  + O * jnp.dtype(w_right.dtype).itemsize + O * bi)
        # Double-buffered streamed tiles + resident weights + headroom.
        vmem = 2 * tm * D * xi + 2 * tm * O * oi + 4 * wbytes + (2 << 20)
        vmem = int(min(max(vmem, 16 << 20), 64 << 20))
        cost = pl.CostEstimate(
            flops=2 * M * (D + O),
            transcendentals=0,
            bytes_accessed=M * D * xi + M * O * oi + wbytes,
        )
        out2 = pl.pallas_call(
            _rank1_kernel,
            out_shape=jax.ShapeDtypeStruct((M, O), out_dtype),
            grid_spec=pltpu.PrefetchScalarGridSpec(
                num_scalar_prefetch=0,
                grid=(num_m,),
                in_specs=[
                    pl.BlockSpec((tm, D), lambda i: (i, 0)),   # streamed x tile
                    pl.BlockSpec((1, D), lambda i: (0, 0)),    # W_left^T : resident
                    pl.BlockSpec((1, O), lambda i: (0, 0)),    # W_right  : resident
                    pl.BlockSpec((1, O), lambda i: (0, 0)),    # bias     : resident
                ],
                out_specs=pl.BlockSpec((tm, O), lambda i: (i, 0)),
            ),
            compiler_params=pltpu.CompilerParams(
                dimension_semantics=("parallel",),
                vmem_limit_bytes=vmem,
            ),
            cost_estimate=cost,
        )(x2, wl_row, wr_row, b2)
    else:
        # Degenerate torch-broadcast cases (R > 1): materialize W ONCE in the wrapper
        # with identical broadcast semantics, stream it O-tiled through a dense kernel.
        # TODO(synk): add K (input_dim) tiling for very large input_dim in this path.
        W = w_left * w_right                                   # torch broadcast semantics
        wi = jnp.dtype(W.dtype).itemsize
        to = O if (O <= 512 or O % 128 != 0) else 512
        num_o = pl.cdiv(O, to)
        vmem = (2 * tm * D * xi + 2 * D * to * wi + 2 * tm * to * oi
                + 2 * to * bi + (2 << 20))
        vmem = int(min(max(vmem, 16 << 20), 64 << 20))
        cost = pl.CostEstimate(
            flops=2 * M * D * O,
            transcendentals=0,
            bytes_accessed=M * D * xi + M * O * oi + D * O * wi + O * bi,
        )
        out2 = pl.pallas_call(
            _dense_w_kernel,
            out_shape=jax.ShapeDtypeStruct((M, O), out_dtype),
            grid_spec=pltpu.PrefetchScalarGridSpec(
                num_scalar_prefetch=0,
                grid=(num_m, num_o),
                in_specs=[
                    pl.BlockSpec((tm, D), lambda i, j: (i, 0)),
                    pl.BlockSpec((D, to), lambda i, j: (0, j)),
                    pl.BlockSpec((1, to), lambda i, j: (0, j)),
                ],
                out_specs=pl.BlockSpec((tm, to), lambda i, j: (i, j)),
            ),
            compiler_params=pltpu.CompilerParams(
                dimension_semantics=("parallel", "parallel"),
                vmem_limit_bytes=vmem,
            ),
            cost_estimate=cost,
        )(x2, W, b2)

    return out2.reshape(*lead, O)


def glorot_uniform(key, shape):
    fan_in, fan_out = shape[0], shape[1]
    limit = math.sqrt(6.0 / (fan_in + fan_out))
    return jax.random.uniform(key, shape, dtype=jnp.float32, minval=-limit, maxval=limit)


if __name__ == "__main__":
    # Shapes consistent with the module: x = (batch, seq, input_dim),
    # input_dim = output_dim = 128 (lane-dense output), rank = 1 (module default).
    B, S, D, O, R = 2, 256, 128, 128, 1

    key = jax.random.PRNGKey(0)
    kx, kl, kr, kb = jax.random.split(key, 4)

    x = jax.random.normal(kx, (B, S, D), dtype=jnp.float32)
    w_left = glorot_uniform(kl, (D, R))
    w_right = glorot_uniform(kr, (R, O))
    # reset_parameters() zeros the bias; use a nonzero one so the bias-add path is
    # exercised by the numerical check.
    b = 0.1 * jax.random.normal(kb, (O,), dtype=jnp.float32)

    out = low_rank_linear(x, w_left, w_right, b)
    out = jax.block_until_ready(out)

    # Pure-JAX reference with identical semantics to the torch forward.
    W = w_left * w_right
    ref = jnp.matmul(x, W, precision=jax.lax.Precision.HIGHEST) + b
    assert out.shape == (B, S, O)
    assert jnp.allclose(out, ref, atol=1e-4, rtol=1e-4), float(jnp.max(jnp.abs(out - ref)))

    # Ragged-M (no pad/slice round-trip) + bf16 (dtype-aware sublane) + bias=False path.
    xb = jax.random.normal(kx, (1, 37, D), dtype=jnp.bfloat16)
    outb = jax.block_until_ready(low_rank_linear(xb, w_left, w_right, None))
    refb = jnp.matmul(xb.astype(jnp.float32), W, precision=jax.lax.Precision.HIGHEST)
    assert outb.shape == (1, 37, O)
    assert jnp.allclose(outb.astype(jnp.float32), refb, atol=3e-2, rtol=3e-2), float(
        jnp.max(jnp.abs(outb.astype(jnp.float32) - refb)))

    print("KERNEL_OK")
</pallas_src>

<mosaic_0001>
module attributes {stable_mosaic.version = 11 : i64} {
  func.func @_rank1_kernel(%arg0: i32, %arg1: memref<128x128xf32, #tpu.memory_space<vmem>>, %arg2: memref<1x128xf32, #tpu.memory_space<vmem>>, %arg3: memref<1x128xf32, #tpu.memory_space<vmem>>, %arg4: memref<1x128xf32, #tpu.memory_space<vmem>>, %arg5: memref<128x128xf32, #tpu.memory_space<vmem>>) attributes {dimension_semantics = [#tpu.dimension_semantics<parallel>], iteration_bounds = array<i64: 4>, scalar_prefetch = 0 : i64, scratch_operands = 0 : i64, tpu.core_type = #tpu.core_type<tc>, window_params = [{transform_indices = @transform_0, window_bounds = array<i64: 128, 128>}, {pipeline_mode = #tpu.pipeline_mode<synchronous>, transform_indices = @transform_1, window_bounds = array<i64: 1, 128>}, {pipeline_mode = #tpu.pipeline_mode<synchronous>, transform_indices = @transform_2, window_bounds = array<i64: 1, 128>}, {pipeline_mode = #tpu.pipeline_mode<synchronous>, transform_indices = @transform_3, window_bounds = array<i64: 1, 128>}, {transform_indices = @transform_4, window_bounds = array<i64: 128, 128>}]} {
    %c0 = arith.constant 0 : index
    %c0_0 = arith.constant 0 : index
    %0 = vector.load %arg1[%c0, %c0_0] : memref<128x128xf32, #tpu.memory_space<vmem>>, vector<128x128xf32>
    %c0_1 = arith.constant 0 : index
    %c0_2 = arith.constant 0 : index
    %1 = vector.load %arg2[%c0_1, %c0_2] : memref<1x128xf32, #tpu.memory_space<vmem>>, vector<1x128xf32>
    %2 = vector.broadcast %1 : vector<1x128xf32> to vector<128x128xf32>
    %3 = arith.mulf %0, %2 : vector<128x128xf32>
    %cst = arith.constant dense<0.000000e+00> : vector<128xf32>
    %4 = vector.multi_reduction <add>, %3, %cst [1] : vector<128x128xf32> to vector<128xf32>
    %5 = vector.shape_cast %4 : vector<128xf32> to vector<128x1xf32>
    %c0_3 = arith.constant 0 : index
    %c0_4 = arith.constant 0 : index
    %6 = vector.load %arg3[%c0_3, %c0_4] : memref<1x128xf32, #tpu.memory_space<vmem>>, vector<1x128xf32>
    %7 = vector.broadcast %5 : vector<128x1xf32> to vector<128x128xf32>
    %8 = vector.broadcast %6 : vector<1x128xf32> to vector<128x128xf32>
    %9 = arith.mulf %7, %8 : vector<128x128xf32>
    %c0_5 = arith.constant 0 : index
    %c0_6 = arith.constant 0 : index
    %10 = vector.load %arg4[%c0_5, %c0_6] : memref<1x128xf32, #tpu.memory_space<vmem>>, vector<1x128xf32>
    %11 = vector.broadcast %10 : vector<1x128xf32> to vector<128x128xf32>
    %12 = arith.addf %9, %11 : vector<128x128xf32>
    %c0_7 = arith.constant 0 : index
    %c0_8 = arith.constant 0 : index
    %13 = vector.load %arg5[%c0_7, %c0_8] : memref<128x128xf32, #tpu.memory_space<vmem>>, vector<128x128xf32>
    tpu.vector_store %arg5[%c0_7, %c0_8], %12 {strides = array<i32>} : memref<128x128xf32, #tpu.memory_space<vmem>>, vector<128x128xf32>,
    return
  }
  func.func @transform_0(%arg0: i32) -> (i32, i32) {
    %c0_i32 = arith.constant 0 : i32
    %c0_i32_0 = arith.constant 0 : i32
    return %arg0, %c0_i32 : i32, i32
  }
  func.func @transform_1(%arg0: i32) -> (i32, i32) {
    %c0_i32 = arith.constant 0 : i32
    %c0_i32_0 = arith.constant 0 : i32
    %c0_i32_1 = arith.constant 0 : i32
    return %c0_i32, %c0_i32_0 : i32, i32
  }
  func.func @transform_2(%arg0: i32) -> (i32, i32) {
    %c0_i32 = arith.constant 0 : i32
    %c0_i32_0 = arith.constant 0 : i32
    %c0_i32_1 = arith.constant 0 : i32
    return %c0_i32, %c0_i32_0 : i32, i32
  }
  func.func @transform_3(%arg0: i32) -> (i32, i32) {
    %c0_i32 = arith.constant 0 : i32
    %c0_i32_0 = arith.constant 0 : i32
    %c0_i32_1 = arith.constant 0 : i32
    return %c0_i32, %c0_i32_0 : i32, i32
  }
  func.func @transform_4(%arg0: i32) -> (i32, i32) {
    %c0_i32 = arith.constant 0 : i32
    %c0_i32_0 = arith.constant 0 : i32
    return %arg0, %c0_i32 : i32, i32
  }
}

</mosaic_0001>

<bundles_post_ra>
// kernel: low_rank_linear.1
= control target key start
LH: loop header
LB: loop body
LE: loop exit
PB: predicated region body
PF: predicated region fallthrough
CT: control target
= control target key end

     0   :  { %9 = vsyncpa [#allocation3], 0  ;;  %s882_s0 = inlined_call_operand.hbm [shape: f32[512,128], index: 0, kind: input, shape index: {}]   ;;  %s883_s1 = inlined_call_operand.vmem [shape: f32[1,128], index: 1, kind: input, shape index: {}]   ;;  %s884_s2 = inlined_call_operand.vmem [shape: f32[1,128], index: 2, kind: input, shape index: {}]   ;;  %s885_s3 = inlined_call_operand.vmem [shape: f32[1,128], index: 3, kind: input, shape index: {}]   ;;  %s886_s4 = inlined_call_operand.hbm [shape: f32[512,128], index: 4, kind: output, shape index: {}]  }
   0x1   :  { %11 = vsyncpa [#allocation3 + $0x1], 0 }
   0x2   :  { %12 = vsyncpa [#allocation4], 0 }
   0x3   :  { %14 = vsyncpa [#allocation4 + $0x1], 0  ;;  %s636_s15 = smov 0   ;;  %s638_s16 = smov 0  }
   0x4   :  { %s640_s17 = smov 0   ;;  %s642_s18 = smov 0  }
   0x5 LB: > { %s657_s19 = sadd.s32 4294967295, %s603_s18   ;;  %s438_s20 = sadd.s32 4294967294, %s603_s18   ;;  %s603_s18 = sphi %s642_s18, %s898_s18   ;;  %s599_s17 = sphi %s640_s17, %s897_s17   ;;  %s595_s16 = sphi %s638_s16, %s896_s16   ;;  %s591_s15 = sphi %s636_s15, %s895_s15  }
   0x6   : > { %s661_s21 = sadd.s32 1, %s603_s18   ;;  %s27_s22 = sadd.s32 1, %s599_s17 }
   0x7   : > { %s24_s23 = ssub.s32 %s603_s18, %s661_s21  ;;  %p34_p0 = scmp.ne.s32.totalorder %s599_s17, %s595_s16 }
   0x8   : > { %p25_p1 = scmp.eq.s32.totalorder %s24_s23, 0  ;;  %p35_p2 = scmp.eq.s32.totalorder %s603_s18, 0 }
   0x9   : > { %p40_p3 = scmp.ne.s32.totalorder %s595_s16, %s591_s15  ;;  %p41_p4 = scmp.eq.s32.totalorder %s657_s19, 0 }
   0xa   : > { %s673_s24 = scalar_select %p25_p1, %s599_s17, %s27_s22  }
   0xb   : > { %p675_p5 = por %p35_p2, %p34_p0  ;;  %p679_p6 = por %p41_p4, %p40_p3 }
   0xc   : > { %p127_p7 = scmp.eq.s32.totalorder %s657_s19, 3  ;;  %p133_p8 = scmp.eq.s32.totalorder %s438_s20, 3 }
   0xd   : > { %p469_p9 = scmp.lt.s32.totalorder %s603_s18, 4  ;;  %s162_s29 = sand.u32 1, %s599_s17  }
   0xe   : > { %p685_p10 = por %p127_p7, %p34_p0  ;;  %p689_p11 = por %p133_p8, %p40_p3 }
   0xf   : > { %s455_s30 = sshll.u32 %s603_s18, 11  ;;  %s441_s5 = sshll.u32 %s162_s29, 7 }
  0x10   : > { %s890_s27 = scalar_select %p685_p10, 1, 0 }
  0x11   : > { %s891_s28 = scalar_select %p689_p11, 1, 0 }
  0x12   : > { %s698_s8 = scalar_lea.hbm %s882_s0, %s455_s30  ;;  %s166_s9 = scalar_lea.vmem [#allocation2], %s441_s5 }
  0x13   : > { %s173_s10 = sshll.u32 %s166_s9, 4  ;;  %p702_p12 = pnand %p469_p9, %p675_p5  ;;  %s706_s10 = int_to_ptr.vmem [resolvable:$true] %s173_s10 }
  0x14   : > { %s708_s12 = scalar_lea.sflag [#allocation3], %s162_s29  ;;  %s507_s13 = scalar_lea.hbm %s698_s8, 2048 }
  0x15   : > { %p508_p13 = scmp.ne.s32.totalorder %s698_s8, %s507_s13  ;;  %p509_p0 = pneg %p702_p12 }
  0x16   : > { %s512_s22 = scalar_lea.hbm %s882_s0, 8192  ;;  %p513_p3 = scmp.lt.u32.totalorder %s698_s8, %s882_s0 }
  0x17   : > { %p510_p1 = pnand %p509_p0, %p508_p13  ;;  %p514_p4 = scmp.lt.u32.totalorder %s512_s22, %s507_s13 }
  0x18   : > { %p516_p7 = scmp.lt.u32.totalorder %s507_s13, %s698_s8 }
  0x19   : > { %p511_p2 = pneg %p510_p1  ;;  %p515_p5 = por %p514_p4, %p513_p3 }
  0x1b   : > { %p517_p8 = por %p516_p7, %p515_p5 }
  0x1d   : > { %p518_p9 = pnand %p517_p8, %p511_p2 }
  0x1f   : > { %521 = shalt.err (!%p518_p9)
}
  0x20   : > { %s522_s29 = scalar_lea.vmem %s706_s10, 2048  ;;  %s605_s30 = smov [#allocation2]  }
  0x21   : > { %p523_p13 = scmp.ne.s32.totalorder %s706_s10, %s522_s29  ;;  %s527_s5 = sshll.u32 %s605_s30, 4  ;;  %s528_s5 = int_to_ptr.vmem [resolvable:$false] %s527_s5 }
  0x22   : > { %s529_s6 = scalar_lea.vmem %s528_s5, 4096  ;;  %p530_p10 = scmp.lt.s32.totalorder %s706_s10, %s528_s5 }
  0x23   : > { %p525_p1 = pnand %p523_p13, %p509_p0  ;;  %p531_p3 = scmp.lt.s32.totalorder %s529_s6, %s522_s29 }
  0x25   : > { %p526_p11 = pneg %p525_p1  ;;  %p532_p4 = por %p531_p3, %p530_p10 }
  0x27   : > { %p533_p5 = pnand %p532_p4, %p526_p11 }
  0x29   : > { %536 = shalt.err (!%p533_p5)
}
  0x2a   : > { %s606_s7 = smov 128   ;;  %s607_s9 = smov 8  }
  0x2b   : > { %464 = dma.hbm_to_vmem [thread:$0]  (!%p702_p12), %s698_s8, 2048, %s706_s10, %s708_s12, %s606_s7, %s606_s7, %s607_s9  }
  0x2c   : > { %p444_p0 = scmp.ge.s32.totalorder %s603_s18, 1  ;;  %p181_p2 = scmp.lt.s32.totalorder %s603_s18, 5 }
  0x2e   : > { %p182_p7 = pnand %p444_p0, %p181_p2 }
  0x2f   : > { %s739_s13 = sand.u32 (!%p182_p7), 1, %s595_s16  }
  0x30   : > { %185 = sbr.rel (%p182_p7) target bundleno = 249 (0xf9), region = 36  ;;  %s445_s14 = sshll.u32 (!%p182_p7), %s739_s13, 7 }
  0x31   : > { %s188_s20 = scalar_lea.sflag (!%p182_p7), [#allocation3], %s739_s13  ;;  %s745_s22 = scalar_lea.vmem (!%p182_p7), [#allocation2], %s445_s14 }
  0x37   : > { %582 = dma.done.wait (%p679_p6), %s188_s20, 2048  }
  0x38   : > { %584 = vsyncadd (%p679_p6), %s188_s20, 4294965248  ;;  %v220_v0 = vld [vmem:[%s745_s22 + $0x10] sm:$0xff]  ;;  %v447_v1 = vld [vmem:[%s883_s1] ss:$0 sm:$0xff]  ;;  %s786_s25 = scalar_lea.vmem [#allocation5], %s445_s14  ;;  %s456_s29 = sshll.u32 %s657_s19, 11 }
  0x39   : > { %v218_v2 = vld [vmem:[%s745_s22] sm:$0xff]  ;;  %v243_v3 = vmul.f32 %v447_v1, %v220_v0  ;;  %v221_v5 = vld [vmem:[%s745_s22 + $0x18] sm:$0xff]  ;;  %v219_v6 = vld [vmem:[%s745_s22 + $0x8] sm:$0xff]  ;;  %s365_s30 = sshll.u32 %s786_s25, 4  ;;  %s833_s7 = scalar_lea.hbm %s886_s4, %s456_s29  ;;  %s835_s30 = int_to_ptr.vmem [resolvable:$true] %s365_s30 }
  0x3a   : > { %v241_v4 = vmul.f32 %v447_v1, %v218_v2  ;;  %v244_v7 = vmul.f32 %v447_v1, %v221_v5  ;;  %v242_v8 = vmul.f32 %v447_v1, %v219_v6  ;;  %v223_v9 = vld [vmem:[%s745_s22 + $0x28] sm:$0xff]  ;;  %v222_v10 = vld [vmem:[%s745_s22 + $0x20] sm:$0xff]  ;;  %v225_v13 = vld [vmem:[%s745_s22 + $0x38] sm:$0xff]  ;;  %s352_s19 = scalar_lea.sflag [#allocation4], %s739_s13  ;;  %s537_s9 = scalar_lea.vmem %s835_s30, 2048 }
  0x3b   : > { %261 = vadd.xlane.f32.xlu1 %v243_v3  ;;  %v246_v11 = vmul.f32 %v447_v1, %v223_v9  ;;  %v245_v12 = vmul.f32 %v447_v1, %v222_v10  ;;  %v224_v14 = vld [vmem:[%s745_s22 + $0x30] sm:$0xff]  ;;  %v248_v15 = vmul.f32 %v447_v1, %v225_v13  ;;  %v227_v17 = vld [vmem:[%s745_s22 + $0x48] sm:$0xff]  ;;  %v226_v18 = vld [vmem:[%s745_s22 + $0x40] sm:$0xff]  ;;  %p538_p6 = scmp.ne.s32.totalorder %s835_s30, %s537_s9  ;;  %p893_p10 = scmp.ne.s32.totalorder %s890_s27, 0 }
  0x3c   : > { %257 = vadd.xlane.f32.xlu0 %v241_v4  ;;  %v247_v16 = vmul.f32 %v447_v1, %v224_v14  ;;  %v250_v19 = vmul.f32 %v447_v1, %v227_v17  ;;  %v249_v20 = vmul.f32 %v447_v1, %v226_v18  ;;  %v229_v21 = vld [vmem:[%s745_s22 + $0x58] sm:$0xff]  ;;  %v228_v22 = vld [vmem:[%s745_s22 + $0x50] sm:$0xff]  ;;  %v231_v25 = vld [vmem:[%s745_s22 + $0x68] sm:$0xff]  ;;  %s608_s14 = smov [#allocation5]  }
  0x3d   : > { %v252_v23 = vmul.f32 %v447_v1, %v229_v21  ;;  %v251_v24 = vmul.f32 %v447_v1, %v228_v22  ;;  %v230_v26 = vld [vmem:[%s745_s22 + $0x60] sm:$0xff]  ;;  %v254_v27 = vmul.f32 %v447_v1, %v231_v25  ;;  %v233_v29 = vld [vmem:[%s745_s22 + $0x78] sm:$0xff]  ;;  %v232_v30 = vld [vmem:[%s745_s22 + $0x70] sm:$0xff]  ;;  %p539_p11 = pnand %p538_p6, %p893_p10  ;;  %s541_s20 = sshll.u32 %s608_s14, 4  ;;  %s542_s20 = int_to_ptr.vmem [resolvable:$false] %s541_s20 }
  0x3e   : > { %v253_v28 = vmul.f32 %v447_v1, %v230_v26  ;;  %v256_v31 = vmul.f32 %v447_v1, %v233_v29  ;;  %v255_v32 = vmul.f32 %v447_v1, %v232_v30  ;;  %v773_v33 = vld [vmem:[%s884_s2] ss:$0 sm:$0xff]  ;;  %s543_s22 = scalar_lea.vmem %s542_s20, 4096  ;;  %p544_p8 = scmp.lt.s32.totalorder %s835_s30, %s542_s20 }
  0x3f   : > { %263 = vadd.xlane.f32.xlu1 %v244_v7  ;;  %v778_v34 = vld [vmem:[%s885_s3] ss:$0 sm:$0xff]  ;;  %p540_p12 = pneg %p539_p11  ;;  %p545_p9 = scmp.lt.s32.totalorder %s543_s22, %s537_s9 }
  0x40   : > { %259 = vadd.xlane.f32.xlu0 %v242_v8 }
  0x41   : > { %p546_p13 = por %p545_p9, %p544_p8 }
  0x43   : > { %267 = vadd.xlane.f32.xlu1 %v246_v11  ;;  %p547_p1 = pnand %p546_p13, %p540_p12 }
  0x44   : > { %265 = vadd.xlane.f32.xlu0 %v245_v12 }
  0x47   : > { %271 = vadd.xlane.f32.xlu1 %v248_v15 }
  0x48   : > { %269 = vadd.xlane.f32.xlu0 %v247_v16 }
  0x4b   : > { %275 = vadd.xlane.f32.xlu1 %v250_v19 }
  0x4c   : > { %273 = vadd.xlane.f32.xlu0 %v249_v20 }
  0x4f   : > { %279 = vadd.xlane.f32.xlu1 %v252_v23 }
  0x50   : > { %277 = vadd.xlane.f32.xlu0 %v251_v24 }
  0x53   : > { %283 = vadd.xlane.f32.xlu1 %v254_v27 }
  0x54   : > { %281 = vadd.xlane.f32.xlu0 %v253_v28 }
  0x57   : > { %287 = vadd.xlane.f32.xlu1 %v256_v31 }
  0x58   : > { %285 = vadd.xlane.f32.xlu0 %v255_v32 }
  0xc8   : > { %v262_v35 = vpop.xlane.xlu1 %261 }
  0xc9   : > { %v258_v36 = vpop.xlane.xlu0 %257  ;;  %v298_v37 = vmul.f32 %v773_v33, %v262_v35 }
  0xca   : > { %v296_v38 = vmul.f32 %v773_v33, %v258_v36 }
  0xcb   : > { %v321_v39 = vadd.f32 %v778_v34, %v298_v37 }
  0xcc   : > { %v319_v40 = vadd.f32 %v778_v34, %v296_v38  ;;  %v264_v41 = vpop.xlane.xlu1 %263 }
  0xcd   : > { %v260_v42 = vpop.xlane.xlu0 %259  ;;  %337 = vst [vmem:[%s786_s25 + $0x10] sm:$0xff] %v321_v39  ;;  %v299_v43 = vmul.f32 %v773_v33, %v264_v41 }
  0xce   : > { %335 = vst [vmem:[%s786_s25] sm:$0xff] %v319_v40  ;;  %v297_v44 = vmul.f32 %v773_v33, %v260_v42 }
  0xcf   : > { %v322_v45 = vadd.f32 %v778_v34, %v299_v43 }
  0xd0   : > { %v320_v46 = vadd.f32 %v778_v34, %v297_v44  ;;  %v268_v47 = vpop.xlane.xlu1 %267 }
  0xd1   : > { %v266_v48 = vpop.xlane.xlu0 %265  ;;  %338 = vst [vmem:[%s786_s25 + $0x18] sm:$0xff] %v322_v45  ;;  %v301_v49 = vmul.f32 %v773_v33, %v268_v47 }
  0xd2   : > { %336 = vst [vmem:[%s786_s25 + $0x8] sm:$0xff] %v320_v46  ;;  %v300_v50 = vmul.f32 %v773_v33, %v266_v48 }
  0xd3   : > { %v324_v51 = vadd.f32 %v778_v34, %v301_v49 }
  0xd4   : > { %v323_v52 = vadd.f32 %v778_v34, %v300_v50  ;;  %v272_v53 = vpop.xlane.xlu1 %271 }
  0xd5   : > { %v270_v54 = vpop.xlane.xlu0 %269  ;;  %340 = vst [vmem:[%s786_s25 + $0x28] sm:$0xff] %v324_v51  ;;  %v303_v55 = vmul.f32 %v773_v33, %v272_v53 }
  0xd6   : > { %339 = vst [vmem:[%s786_s25 + $0x20] sm:$0xff] %v323_v52  ;;  %v302_v56 = vmul.f32 %v773_v33, %v270_v54 }
  0xd7   : > { %v326_v57 = vadd.f32 %v778_v34, %v303_v55 }
  0xd8   : > { %v325_v58 = vadd.f32 %v778_v34, %v302_v56  ;;  %v276_v59 = vpop.xlane.xlu1 %275 }
  0xd9   : > { %v274_v60 = vpop.xlane.xlu0 %273  ;;  %342 = vst [vmem:[%s786_s25 + $0x38] sm:$0xff] %v326_v57  ;;  %v305_v61 = vmul.f32 %v773_v33, %v276_v59 }
  0xda   : > { %341 = vst [vmem:[%s786_s25 + $0x30] sm:$0xff] %v325_v58  ;;  %v304_v62 = vmul.f32 %v773_v33, %v274_v60 }
  0xdb   : > { %v328_v63 = vadd.f32 %v778_v34, %v305_v61 }
  0xdc   : > { %v327_v0 = vadd.f32 %v778_v34, %v304_v62  ;;  %v280_v1 = vpop.xlane.xlu1 %279 }
  0xdd   : > { %v278_v2 = vpop.xlane.xlu0 %277  ;;  %344 = vst [vmem:[%s786_s25 + $0x48] sm:$0xff] %v328_v63  ;;  %v307_v3 = vmul.f32 %v773_v33, %v280_v1 }
  0xde   : > { %343 = vst [vmem:[%s786_s25 + $0x40] sm:$0xff] %v327_v0  ;;  %v306_v4 = vmul.f32 %v773_v33, %v278_v2 }
  0xdf   : > { %v330_v5 = vadd.f32 %v778_v34, %v307_v3 }
  0xe0   : > { %v329_v6 = vadd.f32 %v778_v34, %v306_v4  ;;  %v284_v7 = vpop.xlane.xlu1 %283 }
  0xe1   : > { %v282_v8 = vpop.xlane.xlu0 %281  ;;  %346 = vst [vmem:[%s786_s25 + $0x58] sm:$0xff] %v330_v5  ;;  %v309_v9 = vmul.f32 %v773_v33, %v284_v7 }
  0xe2   : > { %345 = vst [vmem:[%s786_s25 + $0x50] sm:$0xff] %v329_v6  ;;  %v308_v10 = vmul.f32 %v773_v33, %v282_v8 }
  0xe3   : > { %v332_v11 = vadd.f32 %v778_v34, %v309_v9 }
  0xe4   : > { %v331_v12 = vadd.f32 %v778_v34, %v308_v10  ;;  %v288_v13 = vpop.xlane.xlu1 %287 }
  0xe5   : > { %v286_v14 = vpop.xlane.xlu0 %285  ;;  %348 = vst [vmem:[%s786_s25 + $0x68] sm:$0xff] %v332_v11  ;;  %v311_v15 = vmul.f32 %v773_v33, %v288_v13 }
  0xe6   : > { %347 = vst [vmem:[%s786_s25 + $0x60] sm:$0xff] %v331_v12  ;;  %v310_v16 = vmul.f32 %v773_v33, %v286_v14 }
  0xe7   : > { %v334_v17 = vadd.f32 %v778_v34, %v311_v15 }
  0xe8   : > { %v333_v18 = vadd.f32 %v778_v34, %v310_v16 }
  0xe9   : > { %350 = vst [vmem:[%s786_s25 + $0x78] sm:$0xff] %v334_v17 }
  0xea   : > { %349 = vst [vmem:[%s786_s25 + $0x70] sm:$0xff] %v333_v18 }
  0xeb   : > { %550 = shalt.err (!%p547_p1)
}
  0xec   : > { %s551_s8 = scalar_lea.hbm %s833_s7, 2048  ;;  %s555_s11 = scalar_lea.hbm %s886_s4, 8192 }
  0xed   : > { %p552_p3 = scmp.ne.s32.totalorder %s833_s7, %s551_s8  ;;  %p556_p0 = scmp.lt.u32.totalorder %s833_s7, %s886_s4 }
  0xee   : > { %p557_p2 = scmp.lt.u32.totalorder %s555_s11, %s551_s8  ;;  %p559_p6 = scmp.lt.u32.totalorder %s551_s8, %s833_s7 }
  0xef   : > { %p553_p4 = pnand %p552_p3, %p893_p10 }
  0xf0   : > { %p558_p7 = por %p557_p2, %p556_p0 }
  0xf1   : > { %p554_p5 = pneg %p553_p4 }
  0xf2   : > { %p560_p11 = por %p559_p6, %p558_p7 }
  0xf4   : > { %p561_p12 = pnand %p560_p11, %p554_p5 }
  0xf6   : > { %564 = shalt.err (!%p561_p12)
}
  0xf7   : > { %s609_s25 = smov 128   ;;  %s610_s29 = smov 8  }
  0xf8   : > { %459 = dma.vmem_to_hbm [thread:$0]  (%p893_p10), %s835_s30, 2048, %s833_s7, %s352_s19, %s609_s25, %s609_s25, %s610_s29  }
  0xf9 PF: > { %p470_p8 = scmp.ge.s32.totalorder %s603_s18, 2  ;;  %s380_s5 = sand.u32 1, %s591_s15  }
  0xfa   : > { %p894_p9 = scmp.ne.s32.totalorder %s891_s28, 0  ;;  %s381_s6 = scalar_lea.sflag [#allocation4], %s380_s5 }
  0xfc   : > { %p466_p13 = pnand %p470_p8, %p894_p9 }
  0xfe   : > { %586 = dma.done.wait (!%p466_p13), %s381_s6, 2048  }
  0xff   : > { %588 = vsyncadd (!%p466_p13), %s381_s6, 4294965248  ;;  %p17_p1 = scmp.ge.s32.totalorder %s661_s21, 6   ;;  %s895_s15 = smov %s595_s16 }
 0x100   : > { %s896_s16 = smov %s599_s17  ;;  %s897_s17 = smov %s673_s24 }
 0x101   : > { %s898_s18 = smov %s661_s21  ;;  %19 = sbr.rel (!%p17_p1) target bundleno = 5 (0x5), region = 81 }
 0x108   :  { %386 = vsyncpa [#allocation3], 1 }
 0x109   :  { %388 = vsyncpa [#allocation3 + $0x1], 1 }
 0x10a   :  { %389 = vsyncpa [#allocation4], 1 }
 0x10b   :  { %391 = vsyncpa [#allocation4 + $0x1], 1 }

</bundles_post_ra>
